<compile_context>
chip_gen: v7x
topology: tpu7x:2x2x1
jax: 0.10.0
libtpu: 0.0.40
codegen_flags: <defaults>
</compile_context>

<pallas_src>
import functools

import jax
import jax.numpy as jnp
from jax.experimental import pallas as pl
from jax.experimental.pallas import tpu as pltpu

# ---------------------------------------------------------------------------
# Problem sizes (small, but lane/sublane-friendly where it matters).
B, C, H, W = 2, 4, 16, 16          # input:  [2, 4, 16, 16]  (NCHW)
D = C * H * W                      # 1024 flattened features
HID = 128                          # encoder/decoder hidden width
LATENT = 32                        # embedding dim
K = 4                              # number of clusters
BT = 16                            # batch-tile rows: full bf16 [16,128] vreg pack
BIG = 1e30                         # "infinite" squared distance for padded fake clusters


# ---------------------------------------------------------------------------
# Fused Pallas kernel: encoder -> clusterer -> decoder (+ per-row SSE)
# ---------------------------------------------------------------------------
def fused_kernel(x_ref, wslab_ref, w4_ref, bslab_ref, b4_ref,
                 hs_ref, dec_ref, sse_ref, *, n_real):
    """One batch tile of the whole model.

    x_ref     : [BT, D]        f32  (rows >= n_real globally are zero padding)
    wslab_ref : [D+3*HID, HID] bf16 (W1 | W2_wide | W23 | muT_wide), grid-invariant
    w4_ref    : [HID, D]       bf16, grid-invariant
    bslab_ref : [8, HID]       f32  (b1 | b2_wide | b3' | mu_sq | 0...), grid-invariant
    b4_ref    : [1, D]         f32, grid-invariant
    hs_ref    : [BT, 2*HID]    f32  — h in lanes [0,HID), s in lanes [HID,2*HID)
    dec_ref   : [BT, D]        f32
    sse_ref   : [BT, HID]      f32  — per-row masked SSE broadcast across lanes
    """
    i = pl.program_id(0)

    x = x_ref[...]                                                    # [BT, D] f32
    x_bf = x.astype(jnp.bfloat16)

    # Static slices of the grid-invariant packed weight slab (zero-cost views,
    # offsets are multiples of the bf16 (16,128) tile).
    w1 = wslab_ref[0:D, :]                                            # [D,   HID]
    w2 = wslab_ref[D:D + HID, :]                                      # [HID, HID] (cols >= LATENT zero)
    w23 = wslab_ref[D + HID:D + 2 * HID, :]                           # [HID, HID] (= W2 @ W3 folded)
    mut = wslab_ref[D + 2 * HID:D + 3 * HID, :]                       # [HID, HID] (mu^T in [0:LATENT,0:K])

    b1 = bslab_ref[0:1, :]                                            # [1, HID]
    b2 = bslab_ref[1:2, :]                                            # [1, HID] (cols >= LATENT zero)
    b3p = bslab_ref[2:3, :]                                           # b3 + b2 @ W3 (folded)
    mu_sq = bslab_ref[3:4, :]                                         # ||mu_j||^2, BIG past K

    # ---- encoder layer 1 (bf16 MXU, f32 accumulate)
    z1 = jnp.dot(x_bf, w1, preferred_element_type=jnp.float32)        # [BT, HID]
    a1 = jnp.maximum(z1 + b1, 0.0)
    a1_bf = a1.astype(jnp.bfloat16)

    # ---- encoder layer 2 (wide: lanes >= LATENT are exactly zero)
    h = jnp.dot(a1_bf, w2, preferred_element_type=jnp.float32) + b2   # [BT, HID]

    # ---- decoder, starting from a1 via folded W23 (no serial dep on h)
    z3 = jnp.dot(a1_bf, w23, preferred_element_type=jnp.float32) + b3p
    a3 = jnp.maximum(z3, 0.0)
    dec = jnp.dot(a3.astype(jnp.bfloat16), w4_ref[...],
                  preferred_element_type=jnp.float32) + b4_ref[...]   # [BT, D]
    dec_ref[...] = dec

    # ---- clusterer: DEC Student-t via matmul expansion, 128-wide
    # d2_ij = ||h_i||^2 + ||mu_j||^2 - 2 h_i.mu_j ; fake clusters get d2 ~ BIG.
    cross = jnp.dot(h.astype(jnp.bfloat16), mut,
                    preferred_element_type=jnp.float32)               # [BT, HID]
    h_sq = jnp.sum(h * h, axis=-1, keepdims=True)                     # [BT, 1]
    d2 = jnp.maximum(h_sq + mu_sq - 2.0 * cross, 0.0)
    q = pl.reciprocal(1.0 + d2, approx=True)                          # fake lanes ~ 1e-30
    s = q * pl.reciprocal(jnp.sum(q, axis=-1, keepdims=True), approx=True)

    # ---- lane-dense (h | s) slab: one unmasked 256-lane store
    hs_ref[...] = jnp.concatenate([h, s], axis=-1)                    # [BT, 2*HID]

    # ---- per-row SSE, masked to real rows with a [BT,1] vector (no [BT,D] iota)
    err2 = jnp.sum((dec - x) * (dec - x), axis=-1, keepdims=True)     # [BT, 1]
    row = jax.lax.broadcasted_iota(jnp.int32, err2.shape, 0) + i * x_ref.shape[0]
    err2 = jnp.where(row < n_real, err2, 0.0)
    sse_ref[...] = jnp.broadcast_to(err2, sse_ref.shape)


# ---------------------------------------------------------------------------
# Parameter init (deterministic, in-script) and one-time host-side packing.
# ---------------------------------------------------------------------------
def init_params(key):
    ks = jax.random.split(key, 5)
    scale = 0.05
    return {
        "W1": scale * jax.random.normal(ks[0], (D, HID), jnp.float32),
        "b1": jnp.zeros((HID,), jnp.float32),
        "W2": scale * jax.random.normal(ks[1], (HID, LATENT), jnp.float32),
        "b2": jnp.zeros((LATENT,), jnp.float32),
        "mu": jax.random.normal(ks[2], (K, LATENT), jnp.float32),
        "W3": scale * jax.random.normal(ks[3], (LATENT, HID), jnp.float32),
        "b3": jnp.zeros((HID,), jnp.float32),
        "W4": scale * jax.random.normal(ks[4], (HID, D), jnp.float32),
        "b4": jnp.zeros((D,), jnp.float32),
    }


def pack_params(p):
    """Coalesce 10 parameter tensors into 4 HBM slabs (done once, off the hot path)."""
    # Folded decoder entry: z3 = a1 @ (W2 @ W3) + (b3 + b2 @ W3)
    w23 = p["W2"] @ p["W3"]                                           # [HID, HID] f32
    b3p = p["b3"] + p["b2"] @ p["W3"]                                 # [HID]

    w2_wide = jnp.zeros((HID, HID), jnp.float32).at[:, :LATENT].set(p["W2"])
    # Round mu to bf16 once so mu_sq matches the bf16 cross term inside the kernel.
    mu_bf = p["mu"].astype(jnp.bfloat16).astype(jnp.float32)          # [K, LATENT]
    mut_wide = jnp.zeros((HID, HID), jnp.float32).at[:LATENT, :K].set(mu_bf.T)

    wslab = jnp.concatenate([p["W1"], w2_wide, w23, mut_wide],
                            axis=0).astype(jnp.bfloat16)              # [D+3*HID, HID]

    b2_wide = jnp.zeros((HID,), jnp.float32).at[:LATENT].set(p["b2"])
    mu_sq = jnp.full((HID,), BIG, jnp.float32).at[:K].set(jnp.sum(mu_bf * mu_bf, axis=1))
    bslab = (jnp.zeros((8, HID), jnp.float32)
             .at[0].set(p["b1"]).at[1].set(b2_wide).at[2].set(b3p).at[3].set(mu_sq))

    return {
        "wslab": wslab,                                               # [1408, 128] bf16
        "w4": p["W4"].astype(jnp.bfloat16),                           # [128, 1024] bf16
        "bslab": bslab,                                               # [8, 128]    f32
        "b4": p["b4"].reshape(1, D),                                  # [1, 1024]   f32
    }


# ---------------------------------------------------------------------------
# Forward pass (mirrors DeepClusteringModel.forward)
# ---------------------------------------------------------------------------
def deep_clustering_forward(packed, x_nchw, h_prev=None):
    # NOTE: the synthetic encoder is stateless, so `h_prev` is accepted but
    # unused — matching the `if h_prev is None` branch of the reference forward.
    del h_prev
    b = x_nchw.shape[0]
    x = x_nchw.reshape(b, -1).astype(jnp.float32)                     # NCHW -> [N, C*H*W]

    # Pad the batch to a multiple of BT=16 rows (full bf16 sublane packing);
    # padded rows are masked out of the loss and sliced off below.
    bp = ((b + BT - 1) // BT) * BT
    num_tiles = bp // BT
    x_pad = jnp.pad(x, ((0, bp - b), (0, 0)))

    kernel = functools.partial(fused_kernel, n_real=b)
    inv = lambda i: (0, 0)   # grid-invariant weights: DMA'd once, reused every tile

    hs, dec, sse = pl.pallas_call(
        kernel,
        grid=(num_tiles,),
        in_specs=[
            pl.BlockSpec((BT, D), lambda i: (i, 0)),                  # x  (pipelined per tile)
            pl.BlockSpec((D + 3 * HID, HID), inv),                    # W1|W2|W23|muT (bf16)
            pl.BlockSpec((HID, D), inv),                              # W4 (bf16)
            pl.BlockSpec((8, HID), inv),                              # b1|b2|b3'|mu_sq (f32)
            pl.BlockSpec((1, D), inv),                                # b4 (f32)
        ],
        out_specs=(
            pl.BlockSpec((BT, 2 * HID), lambda i: (i, 0)),            # h | s slab
            pl.BlockSpec((BT, D), lambda i: (i, 0)),                  # decoded_x
            pl.BlockSpec((BT, HID), lambda i: (i, 0)),                # per-row SSE
        ),
        out_shape=(
            jax.ShapeDtypeStruct((bp, 2 * HID), jnp.float32),
            jax.ShapeDtypeStruct((bp, D), jnp.float32),
            jax.ShapeDtypeStruct((bp, HID), jnp.float32),
        ),
        compiler_params=pltpu.CompilerParams(
            dimension_semantics=("parallel",)),   # batch tiles shard across v7x's 2 TCs
    )(x_pad, packed["wslab"], packed["w4"], packed["bslab"], packed["b4"])

    return {
        "h": hs[:b, :LATENT],
        "s": hs[:b, HID:HID + K],
        "decoded_x": dec[:b].reshape(x_nchw.shape),
        "decoder_loss": jnp.sum(sse[:, 0]) * (1.0 / float(b * D)),
    }


# ---------------------------------------------------------------------------
if __name__ == "__main__":
    key = jax.random.PRNGKey(0)
    pkey, xkey = jax.random.split(key)
    params = init_params(pkey)
    packed = pack_params(params)
    x = jax.random.normal(xkey, (B, C, H, W), jnp.float32)

    out = jax.jit(deep_clustering_forward)(packed, x)
    out = jax.block_until_ready(out)

    # Light sanity checks on semantics.
    assert out["h"].shape == (B, LATENT)
    assert out["s"].shape == (B, K)
    assert out["decoded_x"].shape == (B, C, H, W)
    row_sums = jnp.sum(out["s"], axis=-1)
    # approx-reciprocal normalization: allow small tolerance on the row sums
    assert bool(jnp.all(jnp.abs(row_sums - 1.0) < 5e-3))
    assert bool(jnp.all(out["s"] >= 0.0))
    assert bool(jnp.isfinite(out["decoder_loss"]))

    print("KERNEL_OK")
</pallas_src>

<mosaic_0001>
module attributes {stable_mosaic.version = 11 : i64} {
  func.func @fused_kernel(%arg0: i32, %arg1: memref<16x1024xf32, #tpu.memory_space<vmem>>, %arg2: memref<1408x128xbf16, #tpu.memory_space<vmem>>, %arg3: memref<128x1024xbf16, #tpu.memory_space<vmem>>, %arg4: memref<8x128xf32, #tpu.memory_space<vmem>>, %arg5: memref<1x1024xf32, #tpu.memory_space<vmem>>, %arg6: memref<16x256xf32, #tpu.memory_space<vmem>>, %arg7: memref<16x1024xf32, #tpu.memory_space<vmem>>, %arg8: memref<16x128xf32, #tpu.memory_space<vmem>>) attributes {dimension_semantics = [#tpu.dimension_semantics<parallel>], iteration_bounds = array<i64: 1>, scalar_prefetch = 0 : i64, scratch_operands = 0 : i64, tpu.core_type = #tpu.core_type<tc>, window_params = [{transform_indices = @transform_0, window_bounds = array<i64: 16, 1024>}, {pipeline_mode = #tpu.pipeline_mode<synchronous>, transform_indices = @transform_1, window_bounds = array<i64: 1408, 128>}, {pipeline_mode = #tpu.pipeline_mode<synchronous>, transform_indices = @transform_2, window_bounds = array<i64: 128, 1024>}, {pipeline_mode = #tpu.pipeline_mode<synchronous>, transform_indices = @transform_3, window_bounds = array<i64: 8, 128>}, {pipeline_mode = #tpu.pipeline_mode<synchronous>, transform_indices = @transform_4, window_bounds = array<i64: 1, 1024>}, {transform_indices = @transform_5, window_bounds = array<i64: 16, 256>}, {transform_indices = @transform_6, window_bounds = array<i64: 16, 1024>}, {transform_indices = @transform_7, window_bounds = array<i64: 16, 128>}]} {
    %c0 = arith.constant 0 : index
    %c0_0 = arith.constant 0 : index
    %0 = vector.load %arg1[%c0, %c0_0] : memref<16x1024xf32, #tpu.memory_space<vmem>>, vector<16x1024xf32>
    %1 = arith.truncf %0 : vector<16x1024xf32> to vector<16x1024xbf16>
    %c0_1 = arith.constant 0 : index
    %c0_2 = arith.constant 0 : index
    %2 = vector.load %arg2[%c0_1, %c0_2] : memref<1408x128xbf16, #tpu.memory_space<vmem>>, vector<1024x128xbf16>
    %c1024 = arith.constant 1024 : index
    %c0_3 = arith.constant 0 : index
    %3 = vector.load %arg2[%c1024, %c0_3] : memref<1408x128xbf16, #tpu.memory_space<vmem>>, vector<128x128xbf16>
    %c1152 = arith.constant 1152 : index
    %c0_4 = arith.constant 0 : index
    %4 = vector.load %arg2[%c1152, %c0_4] : memref<1408x128xbf16, #tpu.memory_space<vmem>>, vector<128x128xbf16>
    %c1280 = arith.constant 1280 : index
    %c0_5 = arith.constant 0 : index
    %5 = vector.load %arg2[%c1280, %c0_5] : memref<1408x128xbf16, #tpu.memory_space<vmem>>, vector<128x128xbf16>
    %c0_6 = arith.constant 0 : index
    %c0_7 = arith.constant 0 : index
    %6 = vector.load %arg4[%c0_6, %c0_7] : memref<8x128xf32, #tpu.memory_space<vmem>>, vector<1x128xf32>
    %c1 = arith.constant 1 : index
    %c0_8 = arith.constant 0 : index
    %7 = vector.load %arg4[%c1, %c0_8] : memref<8x128xf32, #tpu.memory_space<vmem>>, vector<1x128xf32>
    %c2 = arith.constant 2 : index
    %c0_9 = arith.constant 0 : index
    %8 = vector.load %arg4[%c2, %c0_9] : memref<8x128xf32, #tpu.memory_space<vmem>>, vector<1x128xf32>
    %c3 = arith.constant 3 : index
    %c0_10 = arith.constant 0 : index
    %9 = vector.load %arg4[%c3, %c0_10] : memref<8x128xf32, #tpu.memory_space<vmem>>, vector<1x128xf32>
    %cst = arith.constant dense<0.000000e+00> : vector<16x128xf32>
    %10 = tpu.matmul %1, %2, %cst {dimension_numbers = #tpu.dot_dimension_numbers<[1], [0], [0], [1], [0, 0, 1, 1], [], []>} : vector<16x1024xbf16>, vector<1024x128xbf16>, vector<16x128xf32> -> vector<16x128xf32>
    %11 = vector.broadcast %6 : vector<1x128xf32> to vector<16x128xf32>
    %12 = arith.addf %10, %11 : vector<16x128xf32>
    %cst_11 = arith.constant 0.000000e+00 : f32
    %13 = vector.broadcast %cst_11 : f32 to vector<16x128xf32>
    %14 = arith.maximumf %12, %13 : vector<16x128xf32>
    %15 = arith.truncf %14 : vector<16x128xf32> to vector<16x128xbf16>
    %cst_12 = arith.constant dense<0.000000e+00> : vector<16x128xf32>
    %16 = tpu.matmul %15, %3, %cst_12 {dimension_numbers = #tpu.dot_dimension_numbers<[1], [0], [0], [1], [0, 0, 1, 1], [], []>} : vector<16x128xbf16>, vector<128x128xbf16>, vector<16x128xf32> -> vector<16x128xf32>
    %17 = vector.broadcast %7 : vector<1x128xf32> to vector<16x128xf32>
    %18 = arith.addf %16, %17 : vector<16x128xf32>
    %cst_13 = arith.constant dense<0.000000e+00> : vector<16x128xf32>
    %19 = tpu.matmul %15, %4, %cst_13 {dimension_numbers = #tpu.dot_dimension_numbers<[1], [0], [0], [1], [0, 0, 1, 1], [], []>} : vector<16x128xbf16>, vector<128x128xbf16>, vector<16x128xf32> -> vector<16x128xf32>
    %20 = vector.broadcast %8 : vector<1x128xf32> to vector<16x128xf32>
    %21 = arith.addf %19, %20 : vector<16x128xf32>
    %cst_14 = arith.constant 0.000000e+00 : f32
    %22 = vector.broadcast %cst_14 : f32 to vector<16x128xf32>
    %23 = arith.maximumf %21, %22 : vector<16x128xf32>
    %24 = arith.truncf %23 : vector<16x128xf32> to vector<16x128xbf16>
    %c0_15 = arith.constant 0 : index
    %c0_16 = arith.constant 0 : index
    %25 = vector.load %arg3[%c0_15, %c0_16] : memref<128x1024xbf16, #tpu.memory_space<vmem>>, vector<128x1024xbf16>
    %cst_17 = arith.constant dense<0.000000e+00> : vector<16x1024xf32>
    %26 = tpu.matmul %24, %25, %cst_17 {dimension_numbers = #tpu.dot_dimension_numbers<[1], [0], [0], [1], [0, 0, 1, 1], [], []>} : vector<16x128xbf16>, vector<128x1024xbf16>, vector<16x1024xf32> -> vector<16x1024xf32>
    %c0_18 = arith.constant 0 : index
    %c0_19 = arith.constant 0 : index
    %27 = vector.load %arg5[%c0_18, %c0_19] : memref<1x1024xf32, #tpu.memory_space<vmem>>, vector<1x1024xf32>
    %28 = vector.broadcast %27 : vector<1x1024xf32> to vector<16x1024xf32>
    %29 = arith.addf %26, %28 : vector<16x1024xf32>
    %c0_20 = arith.constant 0 : index
    %c0_21 = arith.constant 0 : index
    %30 = vector.load %arg7[%c0_20, %c0_21] : memref<16x1024xf32, #tpu.memory_space<vmem>>, vector<16x1024xf32>
    tpu.vector_store %arg7[%c0_20, %c0_21], %29 {strides = array<i32>} : memref<16x1024xf32, #tpu.memory_space<vmem>>, vector<16x1024xf32>,
    %31 = arith.truncf %18 : vector<16x128xf32> to vector<16x128xbf16>
    %cst_22 = arith.constant dense<0.000000e+00> : vector<16x128xf32>
    %32 = tpu.matmul %31, %5, %cst_22 {dimension_numbers = #tpu.dot_dimension_numbers<[1], [0], [0], [1], [0, 0, 1, 1], [], []>} : vector<16x128xbf16>, vector<128x128xbf16>, vector<16x128xf32> -> vector<16x128xf32>
    %33 = arith.mulf %18, %18 : vector<16x128xf32>
    %cst_23 = arith.constant dense<0.000000e+00> : vector<16xf32>
    %34 = vector.multi_reduction <add>, %33, %cst_23 [1] : vector<16x128xf32> to vector<16xf32>
    %35 = vector.shape_cast %34 : vector<16xf32> to vector<16x1xf32>
    %36 = vector.broadcast %35 : vector<16x1xf32> to vector<16x128xf32>
    %37 = vector.broadcast %9 : vector<1x128xf32> to vector<16x128xf32>
    %38 = arith.addf %36, %37 : vector<16x128xf32>
    %cst_24 = arith.constant 2.000000e+00 : f32
    %39 = vector.broadcast %cst_24 : f32 to vector<16x128xf32>
    %40 = arith.mulf %39, %32 : vector<16x128xf32>
    %41 = arith.subf %38, %40 : vector<16x128xf32>
    %cst_25 = arith.constant 0.000000e+00 : f32
    %42 = vector.broadcast %cst_25 : f32 to vector<16x128xf32>
    %43 = arith.maximumf %41, %42 : vector<16x128xf32>
    %cst_26 = arith.constant 1.000000e+00 : f32
    %44 = vector.broadcast %cst_26 : f32 to vector<16x128xf32>
    %45 = arith.addf %44, %43 : vector<16x128xf32>
    %46 = tpu.reciprocal %45 {approx = true} : vector<16x128xf32> -> vector<16x128xf32>
    %cst_27 = arith.constant dense<0.000000e+00> : vector<16xf32>
    %47 = vector.multi_reduction <add>, %46, %cst_27 [1] : vector<16x128xf32> to vector<16xf32>
    %48 = vector.shape_cast %47 : vector<16xf32> to vector<16x1xf32>
    %49 = tpu.reciprocal %48 {approx = true} : vector<16x1xf32> -> vector<16x1xf32>
    %50 = vector.broadcast %49 : vector<16x1xf32> to vector<16x128xf32>
    %51 = arith.mulf %46, %50 : vector<16x128xf32>
    %52 = tpu.concatenate %18, %51 in 1 : vector<16x128xf32>, vector<16x128xf32> -> vector<16x256xf32>
    %c0_28 = arith.constant 0 : index
    %c0_29 = arith.constant 0 : index
    %53 = vector.load %arg6[%c0_28, %c0_29] : memref<16x256xf32, #tpu.memory_space<vmem>>, vector<16x256xf32>
    tpu.vector_store %arg6[%c0_28, %c0_29], %52 {strides = array<i32>} : memref<16x256xf32, #tpu.memory_space<vmem>>, vector<16x256xf32>,
    %54 = arith.subf %29, %0 : vector<16x1024xf32>
    %55 = arith.subf %29, %0 : vector<16x1024xf32>
    %56 = arith.mulf %54, %55 : vector<16x1024xf32>
    %cst_30 = arith.constant dense<0.000000e+00> : vector<16xf32>
    %57 = vector.multi_reduction <add>, %56, %cst_30 [1] : vector<16x1024xf32> to vector<16xf32>
    %58 = vector.shape_cast %57 : vector<16xf32> to vector<16x1xf32>
    %59 = tpu.iota {dimensions = array<i32: 0>} : vector<16x1xi32>
    %c16_i32 = arith.constant 16 : i32
    %60 = arith.muli %arg0, %c16_i32 : i32
    %61 = vector.broadcast %60 : i32 to vector<16x1xi32>
    %62 = arith.addi %59, %61 : vector<16x1xi32>
    %c2_i32 = arith.constant 2 : i32
    %63 = vector.broadcast %c2_i32 : i32 to vector<16x1xi32>
    %64 = arith.cmpi slt, %62, %63 : vector<16x1xi32>
    %cst_31 = arith.constant 0.000000e+00 : f32
    %65 = vector.broadcast %cst_31 : f32 to vector<16x1xf32>
    %66 = arith.select %64, %58, %65 : vector<16x1xi1>, vector<16x1xf32>
    %67 = vector.shape_cast %66 : vector<16x1xf32> to vector<16x1xf32>
    %68 = vector.broadcast %67 : vector<16x1xf32> to vector<16x128xf32>
    %c0_32 = arith.constant 0 : index
    %c0_33 = arith.constant 0 : index
    %69 = vector.load %arg8[%c0_32, %c0_33] : memref<16x128xf32, #tpu.memory_space<vmem>>, vector<16x128xf32>
    tpu.vector_store %arg8[%c0_32, %c0_33], %68 {strides = array<i32>} : memref<16x128xf32, #tpu.memory_space<vmem>>, vector<16x128xf32>,
    return
  }
  func.func @transform_0(%arg0: i32) -> (i32, i32) {
    %c0_i32 = arith.constant 0 : i32
    %c0_i32_0 = arith.constant 0 : i32
    return %arg0, %c0_i32 : i32, i32
  }
  func.func @transform_1(%arg0: i32) -> (i32, i32) {
    %c0_i32 = arith.constant 0 : i32
    %c0_i32_0 = arith.constant 0 : i32
    %c0_i32_1 = arith.constant 0 : i32
    return %c0_i32, %c0_i32_0 : i32, i32
  }
  func.func @transform_2(%arg0: i32) -> (i32, i32) {
    %c0_i32 = arith.constant 0 : i32
    %c0_i32_0 = arith.constant 0 : i32
    %c0_i32_1 = arith.constant 0 : i32
    return %c0_i32, %c0_i32_0 : i32, i32
  }
  func.func @transform_3(%arg0: i32) -> (i32, i32) {
    %c0_i32 = arith.constant 0 : i32
    %c0_i32_0 = arith.constant 0 : i32
    %c0_i32_1 = arith.constant 0 : i32
    return %c0_i32, %c0_i32_0 : i32, i32
  }
  func.func @transform_4(%arg0: i32) -> (i32, i32) {
    %c0_i32 = arith.constant 0 : i32
    %c0_i32_0 = arith.constant 0 : i32
    %c0_i32_1 = arith.constant 0 : i32
    return %c0_i32, %c0_i32_0 : i32, i32
  }
  func.func @transform_5(%arg0: i32) -> (i32, i32) {
    %c0_i32 = arith.constant 0 : i32
    %c0_i32_0 = arith.constant 0 : i32
    return %arg0, %c0_i32 : i32, i32
  }
  func.func @transform_6(%arg0: i32) -> (i32, i32) {
    %c0_i32 = arith.constant 0 : i32
    %c0_i32_0 = arith.constant 0 : i32
    return %arg0, %c0_i32 : i32, i32
  }
  func.func @transform_7(%arg0: i32) -> (i32, i32) {
    %c0_i32 = arith.constant 0 : i32
    %c0_i32_0 = arith.constant 0 : i32
    return %arg0, %c0_i32 : i32, i32
  }
}

</mosaic_0001>

<bundles_post_ra>
// kernel: deep_clustering_forward.1
= control target key start
LH: loop header
LB: loop body
LE: loop exit
PB: predicated region body
PF: predicated region fallthrough
CT: control target
= control target key end

     0   :  { %13 = vsyncpa [#allocation3], 0  ;;  %s2596_s0 = inlined_call_operand.vmem [shape: f32[16,1024], index: 0, kind: input, shape index: {}]   ;;  %s2597_s1 = inlined_call_operand.hbm [shape: bf16[1408,128], index: 1, kind: input, shape index: {}]   ;;  %s2598_s2 = inlined_call_operand.hbm [shape: bf16[128,1024], index: 2, kind: input, shape index: {}]   ;;  %s2599_s3 = inlined_call_operand.vmem [shape: f32[8,128], index: 3, kind: input, shape index: {}]   ;;  %s2600_s4 = inlined_call_operand.vmem [shape: f32[1,1024], index: 4, kind: input, shape index: {}]   ;;  %s2601_s5 = inlined_call_operand.vmem [shape: f32[16,256], index: 5, kind: output, shape index: {0}]   ;;  %s2602_s6 = inlined_call_operand.vmem [shape: f32[16,1024], index: 6, kind: output, shape index: {1}]   ;;  %s2603_s7 = inlined_call_operand.vmem [shape: f32[16,128], index: 7, kind: output, shape index: {2}]  }
   0x1   :  { %14 = vsyncpa [#allocation5], 0  ;;  %s2303_s24 = smov [#allocation2]   ;;  %s2255_s28 = scalar_lea.hbm %s2597_s1, 11264 }
   0x2   :  { %s22_s25 = sshll.u32 %s2303_s24, 4  ;;  %p2256_p0 = scmp.ne.s32.totalorder %s2597_s1, %s2255_s28  ;;  %s23_s25 = int_to_ptr.vmem [resolvable:$true] %s22_s25 }
   0x3   :  { %p2259_p1 = scmp.lt.u32.totalorder %s2255_s28, %s2597_s1 }
   0x5   :  { %p2261_p2 = pnand %p2259_p1, %p2256_p0 }
   0x7   :  { %2264 = shalt.err (!%p2261_p2)
}
   0x8   :  { %s2265_s10 = scalar_lea.vmem %s23_s25, 11264  ;;  %p2270_p4 = scmp.lt.s32.totalorder %s23_s25, %s23_s25 }
   0x9   :  { %p2266_p3 = scmp.ne.s32.totalorder %s23_s25, %s2265_s10  ;;  %p2271_p5 = scmp.lt.s32.totalorder %s2265_s10, %s2265_s10 }
   0xb   :  { %p2272_p6 = por %p2271_p5, %p2270_p4 }
   0xd   :  { %p2273_p7 = pnand %p2272_p6, %p2266_p3 }
   0xf   :  { %2276 = shalt.err (!%p2273_p7)
}
  0x10   :  { %s2304_s11 = smov 64   ;;  %s2305_s12 = smov 4  }
  0x11   :  { %28 = dma.hbm_to_vmem [thread:$0]  %s2597_s1, 11264, %s23_s25, [#allocation3], %s2304_s11, %s2304_s11, %s2305_s12  }
  0x12   :  { %s2306_s15 = smov [#allocation4]   ;;  %s2277_s19 = scalar_lea.hbm %s2598_s2, 8192 }
  0x13   :  { %s34_s16 = sshll.u32 %s2306_s15, 4  ;;  %p2278_p8 = scmp.ne.s32.totalorder %s2598_s2, %s2277_s19  ;;  %s35_s16 = int_to_ptr.vmem [resolvable:$true] %s34_s16 }
  0x14   :  { %p2281_p9 = scmp.lt.u32.totalorder %s2277_s19, %s2598_s2 }
  0x16   :  { %p2283_p10 = pnand %p2281_p9, %p2278_p8 }
  0x18   :  { %2286 = shalt.err (!%p2283_p10)
}
  0x19   :  { %s2287_s24 = scalar_lea.vmem %s35_s16, 8192  ;;  %p2292_p12 = scmp.lt.s32.totalorder %s35_s16, %s35_s16 }
  0x1a   :  { %p2288_p11 = scmp.ne.s32.totalorder %s35_s16, %s2287_s24  ;;  %p2293_p13 = scmp.lt.s32.totalorder %s2287_s24, %s2287_s24 }
  0x1c   :  { %p2294_p0 = por %p2293_p13, %p2292_p12 }
  0x1e   :  { %p2295_p1 = pnand %p2294_p0, %p2288_p11 }
  0x20   :  { %2298 = shalt.err (!%p2295_p1)
}
  0x21   :  { %s2307_s1 = smov 512   ;;  %s2308_s25 = smov 32  }
  0x22   :  { %40 = dma.hbm_to_vmem [thread:$0]  %s2598_s2, 8192, %s35_s16, [#allocation5], %s2307_s1, %s2307_s1, %s2308_s25  }
  0x23   :  { %2299 = dma.done.wait [#allocation3], 11264  }
  0x24   :  { %2300 = vsyncadd [#allocation3], 4294956032 }
  0x25   :  { %2301 = dma.done.wait [#allocation5], 8192  }
  0x26   :  { %2302 = vsyncadd [#allocation5], 4294959104  ;;  %v2155_v0 = vld [vmem:[#allocation2 + $0x40] sm:$0xff]   ;;  %v2159_v4 = vld [vmem:[#allocation2 + $0x48] sm:$0xff]   ;;  %vm2310_vm0 = vmmov 0  }
  0x27   :  { %v2156_v1 = vld [vmem:[#allocation2 + $0xc0] sm:$0xff]   ;;  %1971 = vmatprep.subr.bf16.mxu0 %v2155_v0  ;;  %v2160_v5 = vld [vmem:[#allocation2 + $0xc8] sm:$0xff]   ;;  %v2163_v8 = vld [vmem:[#allocation2 + $0x50] sm:$0xff]  }
  0x28   :  { %v2157_v2 = vld [vmem:[#allocation2] sm:$0xff]   ;;  %1993 = vmatprep.subr.bf16.mxu1 %v2156_v1  ;;  %v2161_v6 = vld [vmem:[#allocation2 + $0x8] sm:$0xff]   ;;  %v2164_v9 = vld [vmem:[#allocation2 + $0xd0] sm:$0xff]  }
  0x29   :  { %v2158_v3 = vld [vmem:[#allocation2 + $0x80] sm:$0xff]   ;;  %1972 = vmatpush3.bf16.msra.mxu0 %v2157_v2  ;;  %v2162_v7 = vld [vmem:[#allocation2 + $0x88] sm:$0xff]   ;;  %v2165_v10 = vld [vmem:[#allocation2 + $0x10] sm:$0xff]  }
  0x2a   :  { %1994 = vmatpush3.bf16.msra.mxu1 %v2158_v3  ;;  %1973 = vmatprep.subr.bf16.mxu0 %v2159_v4  ;;  %v2166_v11 = vld [vmem:[#allocation2 + $0x90] sm:$0xff]   ;;  %v2167_v12 = vld [vmem:[#allocation2 + $0x58] sm:$0xff]   ;;  %v2171_v16 = vld [vmem:[#allocation2 + $0x60] sm:$0xff]  }
  0x2b   :  { %1995 = vmatprep.subr.bf16.mxu1 %v2160_v5  ;;  %v2168_v13 = vld [vmem:[#allocation2 + $0xd8] sm:$0xff]   ;;  %v2172_v17 = vld [vmem:[#allocation2 + $0xe0] sm:$0xff]   ;;  %v2175_v20 = vld [vmem:[#allocation2 + $0x68] sm:$0xff]  }
  0x2c   :  { %v2169_v14 = vld [vmem:[#allocation2 + $0x18] sm:$0xff]   ;;  %v2173_v18 = vld [vmem:[#allocation2 + $0x20] sm:$0xff]   ;;  %v2176_v21 = vld [vmem:[#allocation2 + $0xe8] sm:$0xff]  }
  0x2d   :  { %1974 = vmatpush3.bf16.msra.mxu0 %v2161_v6  ;;  %v2170_v15 = vld [vmem:[#allocation2 + $0x98] sm:$0xff]   ;;  %v2174_v19 = vld [vmem:[#allocation2 + $0xa0] sm:$0xff]   ;;  %v2177_v22 = vld [vmem:[#allocation2 + $0x28] sm:$0xff]  }
  0x2e   :  { %1996 = vmatpush3.bf16.msra.mxu1 %v2162_v7  ;;  %1975 = vmatprep.subr.bf16.mxu0 %v2163_v8  ;;  %v2178_v23 = vld [vmem:[#allocation2 + $0xa8] sm:$0xff]   ;;  %v2179_v24 = vld [vmem:[#allocation2 + $0x70] sm:$0xff]   ;;  %v2183_v28 = vld [vmem:[#allocation2 + $0x78] sm:$0xff]  }
  0x2f   :  { %1997 = vmatprep.subr.bf16.mxu1 %v2164_v9  ;;  %v2180_v25 = vld [vmem:[#allocation2 + $0xf0] sm:$0xff]   ;;  %v2184_v29 = vld [vmem:[#allocation2 + $0xf8] sm:$0xff]   ;;  %v53_v32 = vld [vmem:[%s2596_s0 + $0x8] sm:$0xff] }
  0x30   :  { %v2181_v26 = vld [vmem:[#allocation2 + $0x30] sm:$0xff]   ;;  %v2185_v30 = vld [vmem:[#allocation2 + $0x38] sm:$0xff]   ;;  %v61_v33 = vld [vmem:[%s2596_s0 + $0x48] sm:$0xff] }
  0x31   :  { %1976 = vmatpush3.bf16.msra.mxu0 %v2165_v10  ;;  %v2182_v27 = vld [vmem:[#allocation2 + $0xb0] sm:$0xff]   ;;  %v2186_v31 = vld [vmem:[#allocation2 + $0xb8] sm:$0xff]   ;;  %v69_v35 = vpack.c.bf16 %v61_v33, %v53_v32  ;;  %v52_v37 = vld [vmem:[%s2596_s0] sm:$0xff] }
  0x32   :  { %1998 = vmatpush3.bf16.msra.mxu1 %v2166_v11  ;;  %1977 = vmatprep.subr.bf16.mxu0 %v2167_v12  ;;  %v55_v34 = vld [vmem:[%s2596_s0 + $0x18] sm:$0xff]  ;;  %v60_v38 = vld [vmem:[%s2596_s0 + $0x40] sm:$0xff]  ;;  %v54_v41 = vld [vmem:[%s2596_s0 + $0x10] sm:$0xff] }
  0x33   :  { %1999 = vmatprep.subr.bf16.mxu1 %v2168_v13  ;;  %v63_v36 = vld [vmem:[%s2596_s0 + $0x58] sm:$0xff]  ;;  %v68_v40 = vpack.c.bf16 %v60_v38, %v52_v37  ;;  %v62_v42 = vld [vmem:[%s2596_s0 + $0x50] sm:$0xff]  ;;  %676 = vmatprep.mubr.bf16.mxu0 %v69_v35  ;;  %v2187_v44 = vld [vmem:[#allocation2 + $0x140] sm:$0xff]  }
  0x34   :  { %v71_v39 = vpack.c.bf16 %v63_v36, %v55_v34  ;;  %v70_v43 = vpack.c.bf16 %v62_v42, %v54_v41  ;;  %v2188_v45 = vld [vmem:[#allocation2 + $0x1c0] sm:$0xff]   ;;  %v2191_v48 = vld [vmem:[#allocation2 + $0x148] sm:$0xff]   ;;  %v2195_v52 = vld [vmem:[#allocation2 + $0x150] sm:$0xff]  }
  0x35   :  { %1978 = vmatpush3.bf16.msra.mxu0 %v2169_v14  ;;  %v2189_v46 = vld [vmem:[#allocation2 + $0x100] sm:$0xff]   ;;  %v2192_v49 = vld [vmem:[#allocation2 + $0x1c8] sm:$0xff]   ;;  %v2196_v53 = vld [vmem:[#allocation2 + $0x1d0] sm:$0xff]  }
  0x36   :  { %2000 = vmatpush3.bf16.msra.mxu1 %v2170_v15  ;;  %1979 = vmatprep.subr.bf16.mxu0 %v2171_v16  ;;  %v2190_v47 = vld [vmem:[#allocation2 + $0x180] sm:$0xff]   ;;  %v2193_v50 = vld [vmem:[#allocation2 + $0x108] sm:$0xff]   ;;  %v2197_v54 = vld [vmem:[#allocation2 + $0x110] sm:$0xff]  }
  0x37   :  { %2001 = vmatprep.subr.bf16.mxu1 %v2172_v17  ;;  %717 = vmatprep.mubr.bf16.mxu1 %v71_v39  ;;  %v2194_v51 = vld [vmem:[#allocation2 + $0x188] sm:$0xff]   ;;  %v2198_v55 = vld [vmem:[#allocation2 + $0x190] sm:$0xff]   ;;  %v2199_v56 = vld [vmem:[#allocation2 + $0x158] sm:$0xff]  }
  0x38   :  { %v2200_v57 = vld [vmem:[#allocation2 + $0x1d8] sm:$0xff]   ;;  %v2203_v60 = vld [vmem:[#allocation2 + $0x160] sm:$0xff]   ;;  %v2207_v0 = vld [vmem:[#allocation2 + $0x168] sm:$0xff]  }
  0x39   :  { %1980 = vmatpush3.bf16.msra.mxu0 %v2173_v18  ;;  %v2201_v58 = vld [vmem:[#allocation2 + $0x118] sm:$0xff]   ;;  %v2204_v61 = vld [vmem:[#allocation2 + $0x1e0] sm:$0xff]   ;;  %v2208_v1 = vld [vmem:[#allocation2 + $0x1e8] sm:$0xff]  }
  0x3a   :  { %2002 = vmatpush3.bf16.msra.mxu1 %v2174_v19  ;;  %1981 = vmatprep.subr.bf16.mxu0 %v2175_v20  ;;  %v2202_v59 = vld [vmem:[#allocation2 + $0x198] sm:$0xff]   ;;  %v2205_v62 = vld [vmem:[#allocation2 + $0x120] sm:$0xff]   ;;  %v2209_v2 = vld [vmem:[#allocation2 + $0x128] sm:$0xff]  }
  0x3b   :  { %2003 = vmatprep.subr.bf16.mxu1 %v2176_v21  ;;  %v2206_v63 = vld [vmem:[#allocation2 + $0x1a0] sm:$0xff]   ;;  %v2210_v3 = vld [vmem:[#allocation2 + $0x1a8] sm:$0xff]   ;;  %v2211_v4 = vld [vmem:[#allocation2 + $0x170] sm:$0xff]  }
  0x3c   :  { %v2212_v5 = vld [vmem:[#allocation2 + $0x1f0] sm:$0xff]   ;;  %v2215_v8 = vld [vmem:[#allocation2 + $0x178] sm:$0xff]   ;;  %v2403_v12 = vld [vmem:[%s2596_s0 + $0x28] sm:$0xff] }
  0x3d   :  { %1982 = vmatpush3.bf16.msra.mxu0 %v2177_v22  ;;  %v2213_v6 = vld [vmem:[#allocation2 + $0x130] sm:$0xff]   ;;  %v2216_v9 = vld [vmem:[#allocation2 + $0x1f8] sm:$0xff]   ;;  %v65_v13 = vld [vmem:[%s2596_s0 + $0x68] sm:$0xff] }
  0x3e   :  { %2004 = vmatpush3.bf16.msra.mxu1 %v2178_v23  ;;  %1983 = vmatprep.subr.bf16.mxu0 %v2179_v24  ;;  %v2214_v7 = vld [vmem:[#allocation2 + $0x1b0] sm:$0xff]   ;;  %v2217_v10 = vld [vmem:[#allocation2 + $0x138] sm:$0xff]   ;;  %v73_v16 = vpack.c.bf16 %v65_v13, %v2403_v12  ;;  %v2421_v18 = vld [vmem:[%s2596_s0 + $0x20] sm:$0xff] }
  0x3f   :  { %2005 = vmatprep.subr.bf16.mxu1 %v2180_v25  ;;  %v2218_v11 = vld [vmem:[#allocation2 + $0x1b8] sm:$0xff]   ;;  %v64_v19 = vld [vmem:[%s2596_s0 + $0x60] sm:$0xff]  ;;  %v2429_v20 = vld [vmem:[%s2596_s0 + $0x30] sm:$0xff] }
  0x40   :  { %v2411_v14 = vld [vmem:[%s2596_s0 + $0x38] sm:$0xff]  ;;  %v72_v21 = vpack.c.bf16 %v64_v19, %v2421_v18  ;;  %v66_v22 = vld [vmem:[%s2596_s0 + $0x70] sm:$0xff]  ;;  %v2219_v24 = vld [vmem:[#allocation2 + $0x200] sm:$0xff]  }
  0x41   :  { %1984 = vmatpush3.bf16.msra.mxu0 %v2181_v26  ;;  %v67_v15 = vld [vmem:[%s2596_s0 + $0x78] sm:$0xff]  ;;  %v74_v23 = vpack.c.bf16 %v66_v22, %v2429_v20  ;;  %v2220_v25 = vld [vmem:[#allocation2 + $0x240] sm:$0xff]   ;;  %v2309_v26 = vmov 0.0   ;;  %v2229_v35 = vld [vmem:[#allocation2 + $0x228] sm:$0xff]  }
  0x42   :  { %2006 = vmatpush3.bf16.msra.mxu1 %v2182_v27  ;;  %1985 = vmatprep.subr.bf16.mxu0 %v2183_v28  ;;  %v75_v17 = vpack.c.bf16 %v67_v15, %v2411_v14  ;;  %1800 = vst [vmem:[%s2603_s7 + $0x8] sm:$0xff] %v2309_v26  ;;  %v2221_v27 = vld [vmem:[#allocation2 + $0x208] sm:$0xff]   ;;  %v2226_v32 = vld [vmem:[#allocation2 + $0x258] sm:$0xff]   ;;  %v2227_v33 = vld [vmem:[#allocation2 + $0x220] sm:$0xff]  }
  0x43   :  { %2007 = vmatprep.subr.bf16.mxu1 %v2184_v29  ;;  %v2222_v28 = vld [vmem:[#allocation2 + $0x248] sm:$0xff]   ;;  %v2223_v29 = vld [vmem:[#allocation2 + $0x210] sm:$0xff]   ;;  %v2228_v34 = vld [vmem:[#allocation2 + $0x260] sm:$0xff]  }
  0x44   :  { %v2230_v36 = vld [vmem:[#allocation2 + $0x268] sm:$0xff]   ;;  %v2231_v37 = vld [vmem:[#allocation2 + $0x230] sm:$0xff]   ;;  %v2233_v39 = vld [vmem:[#allocation2 + $0x238] sm:$0xff]  }
  0x45   :  { %1986 = vmatpush3.bf16.msra.mxu0 %v2185_v30  ;;  %v2224_v30 = vld [vmem:[#allocation2 + $0x250] sm:$0xff]   ;;  %v1000_v41 = vld [vmem:[#allocation4] sm:$0xff] }
  0x46   :  { %2008 = vmatpush3.bf16.msra.mxu1 %v2186_v31  ;;  %2015 = vmatprep.subr.bf16.mxu0 %v2187_v44  ;;  %v2225_v31 = vld [vmem:[#allocation2 + $0x218] sm:$0xff]   ;;  %v2232_v38 = vld [vmem:[#allocation2 + $0x270] sm:$0xff]   ;;  %v1004_v42 = vld [vmem:[#allocation4 + $0x20] sm:$0xff] }
  0x47   :  { %2037 = vmatprep.subr.bf16.mxu1 %v2188_v45  ;;  %v1898_v44 = vcombine.low %v1000_v41, %v1004_v42  ;;  %v1899_v45 = vcombine.high %v1000_v41, %v1004_v42  ;;  %v1008_v22 = vld [vmem:[#allocation4 + $0x40] sm:$0xff]  ;;  %v1025_v42 = vld [vmem:[#allocation4 + $0xc8] sm:$0xff] }
  0x48   :  { %677 = vmatmul.mubr.bf16.vlgmr.msra.gmra.mrb[0].mxu0 %v68_v40  ;;  %v2234_v40 = vld [vmem:[#allocation2 + $0x278] sm:$0xff]   ;;  %v1028_v41 = vld [vmem:[#allocation4 + $0xe0] sm:$0xff] }
  0x49   :  { %718 = vmatmul.mubr.bf16.vlgmr.msra.gmra.mrb[0].mxu1 %v70_v43  ;;  %2016 = vmatpush3.bf16.msra.mxu0 %v2189_v46  ;;  %v1001_v43 = vld [vmem:[#allocation4 + $0x8] sm:$0xff] }
  0x4a   :  { %2038 = vmatpush3.bf16.msra.mxu1 %v2190_v47  ;;  %2017 = vmatprep.subr.bf16.mxu0 %v2191_v48  ;;  %v1005_v46 = vld [vmem:[#allocation4 + $0x28] sm:$0xff] }
  0x4b   :  { %2039 = vmatprep.subr.bf16.mxu1 %v2192_v49  ;;  %758 = vmatprep.mubr.bf16.mxu0 %v73_v16  ;;  %v1900_v47 = vcombine.low %v1001_v43, %v1005_v46  ;;  %v1901_v48 = vcombine.high %v1001_v43, %v1005_v46  ;;  %v1029_v43 = vld [vmem:[#allocation4 + $0xe8] sm:$0xff] }
  0x4c   :  { %799 = vmatprep.mubr.bf16.mxu1 %v75_v17 }
  0x4d   :  { %2018 = vmatpush3.bf16.msra.mxu0 %v2193_v50 }
  0x4e   :  { %2040 = vmatpush3.bf16.msra.mxu1 %v2194_v51  ;;  %2019 = vmatprep.subr.bf16.mxu0 %v2195_v52  ;;  %v1815_v51 = vld [vmem:[%s2599_s3] ss:$0 sm:$0xff] }
  0x4f   :  { %2041 = vmatprep.subr.bf16.mxu1 %v2196_v53 }
  0x51   :  { %2020 = vmatpush3.bf16.msra.mxu0 %v2197_v54 }
  0x52   :  { %2042 = vmatpush3.bf16.msra.mxu1 %v2198_v55  ;;  %2021 = vmatprep.subr.bf16.mxu0 %v2199_v56 }
  0x53   :  { %2043 = vmatprep.subr.bf16.mxu1 %v2200_v57 }
  0x55   :  { %2022 = vmatpush3.bf16.msra.mxu0 %v2201_v58 }
  0x56   :  { %2044 = vmatpush3.bf16.msra.mxu1 %v2202_v59  ;;  %2023 = vmatprep.subr.bf16.mxu0 %v2203_v60 }
  0x57   :  { %2045 = vmatprep.subr.bf16.mxu1 %v2204_v61 }
  0x59   :  { %2024 = vmatpush3.bf16.msra.mxu0 %v2205_v62 }
  0x5a   :  { %2046 = vmatpush3.bf16.msra.mxu1 %v2206_v63  ;;  %2025 = vmatprep.subr.bf16.mxu0 %v2207_v0 }
  0x5b   :  { %2047 = vmatprep.subr.bf16.mxu1 %v2208_v1 }
  0x5d   :  { %2026 = vmatpush3.bf16.msra.mxu0 %v2209_v2 }
  0x5e   :  { %2048 = vmatpush3.bf16.msra.mxu1 %v2210_v3  ;;  %2027 = vmatprep.subr.bf16.mxu0 %v2211_v4 }
  0x5f   :  { %2049 = vmatprep.subr.bf16.mxu1 %v2212_v5 }
  0x61   :  { %2028 = vmatpush3.bf16.msra.mxu0 %v2213_v6 }
  0x62   :  { %2050 = vmatpush3.bf16.msra.mxu1 %v2214_v7  ;;  %2029 = vmatprep.subr.bf16.mxu0 %v2215_v8 }
  0x63   :  { %2051 = vmatprep.subr.bf16.mxu1 %v2216_v9 }
  0x65   :  { %2030 = vmatpush3.bf16.msra.mxu0 %v2217_v10 }
  0x66   :  { %2052 = vmatpush3.bf16.msra.mxu1 %v2218_v11  ;;  %2086 = vmatprep.subr.bf16.mxu0 %v2309_v26 }
  0x67   :  { %2106 = vmatprep.subr.bf16.mxu1 %v2309_v26 }
  0x68   :  { %759 = vmatmul.mubr.bf16.vlgmr.msra.gmra.mrb[4].mxu0 %v72_v21 }
  0x69   :  { %800 = vmatmul.mubr.bf16.vlgmr.msra.gmra.mrb[4].mxu1 %v74_v23  ;;  %2087 = vmatpush3.bf16.msra.mxu0 %v2219_v24  ;;  %v1012_v23 = vld [vmem:[#allocation4 + $0x60] sm:$0xff]  ;;  %v1009_v24 = vld [vmem:[#allocation4 + $0x48] sm:$0xff] }
  0x6a   :  { %2107 = vmatpush3.bf16.msra.mxu1 %v2220_v25  ;;  %2088 = vmatprep.subr.bf16.mxu0 %v2309_v26  ;;  %v1013_v25 = vld [vmem:[#allocation4 + $0x68] sm:$0xff] }
  0x6b   :  { %2108 = vmatprep.subr.bf16.mxu1 %v2309_v26  ;;  %2102 = vmatprep.mubr.msk.bf16.mxu0 %vm2310_vm0, %v2309_v26 }
  0x6c   :  { %2122 = vmatprep.mubr.msk.bf16.mxu1 %vm2310_vm0, %v2309_v26 }
  0x6d   :  { %2089 = vmatpush3.bf16.msra.mxu0 %v2221_v27 }
  0x6e   :  { %2109 = vmatpush3.bf16.msra.mxu1 %v2222_v28  ;;  %2090 = vmatprep.subr.bf16.mxu0 %v2309_v26 }
  0x6f   :  { %2110 = vmatprep.subr.bf16.mxu1 %v2309_v26 }
  0x71   :  { %2091 = vmatpush3.bf16.msra.mxu0 %v2223_v29 }
  0x72   :  { %2111 = vmatpush3.bf16.msra.mxu1 %v2224_v30  ;;  %2092 = vmatprep.subr.bf16.mxu0 %v2309_v26  ;;  %v1907_v30 = vcombine.high %v1008_v22, %v1012_v23 }
  0x73   :  { %2112 = vmatprep.subr.bf16.mxu1 %v2309_v26 }
  0x75   :  { %2093 = vmatpush3.bf16.msra.mxu0 %v2225_v31  ;;  %v1909_v31 = vcombine.high %v1009_v24, %v1013_v25 }
  0x76   :  { %2113 = vmatpush3.bf16.msra.mxu1 %v2226_v32  ;;  %2094 = vmatprep.subr.bf16.mxu0 %v2309_v26  ;;  %v1016_v32 = vld [vmem:[#allocation4 + $0x80] sm:$0xff] }
  0x77   :  { %2114 = vmatprep.subr.bf16.mxu1 %v2309_v26 }
  0x79   :  { %2095 = vmatpush3.bf16.msra.mxu0 %v2227_v33  ;;  %v1020_v33 = vld [vmem:[#allocation4 + $0xa0] sm:$0xff] }
  0x7a   :  { %2115 = vmatpush3.bf16.msra.mxu1 %v2228_v34  ;;  %2096 = vmatprep.subr.bf16.mxu0 %v2309_v26  ;;  %v1017_v34 = vld [vmem:[#allocation4 + $0x88] sm:$0xff] }
  0x7b   :  { %2116 = vmatprep.subr.bf16.mxu1 %v2309_v26 }
  0x7d   :  { %2097 = vmatpush3.bf16.msra.mxu0 %v2229_v35  ;;  %v1021_v35 = vld [vmem:[#allocation4 + $0xa8] sm:$0xff] }
  0x7e   :  { %2117 = vmatpush3.bf16.msra.mxu1 %v2230_v36  ;;  %2098 = vmatprep.subr.bf16.mxu0 %v2309_v26  ;;  %v1906_v36 = vcombine.low %v1008_v22, %v1012_v23  ;;  %v1916_v46 = vcombine.low %v1017_v34, %v1021_v35  ;;  %v1002_v22 = vld [vmem:[#allocation4 + $0x10] sm:$0xff] }
  0x7f   :  { %2118 = vmatprep.subr.bf16.mxu1 %v2309_v26  ;;  %v1006_v23 = vld [vmem:[#allocation4 + $0x30] sm:$0xff] }
  0x81   :  { %2099 = vmatpush3.bf16.msra.mxu0 %v2231_v37  ;;  %v1908_v37 = vcombine.low %v1009_v24, %v1013_v25  ;;  %v1003_v24 = vld [vmem:[#allocation4 + $0x18] sm:$0xff]  ;;  %v1902_v25 = vcombine.low %v1002_v22, %v1006_v23 }
  0x82   :  { %2119 = vmatpush3.bf16.msra.mxu1 %v2232_v38  ;;  %2100 = vmatprep.subr.bf16.mxu0 %v2309_v26  ;;  %v1915_v38 = vcombine.high %v1016_v32, %v1020_v33 }
  0x83   :  { %2120 = vmatprep.subr.bf16.mxu1 %v2309_v26 }
  0x85   :  { %2101 = vmatpush3.bf16.msra.mxu0 %v2233_v39  ;;  %v1917_v39 = vcombine.high %v1017_v34, %v1021_v35 }
  0x86   :  { %2121 = vmatpush3.bf16.msra.mxu1 %v2234_v40  ;;  %1426 = vmatprep.subr.bf16.mxu0 %v1899_v45  ;;  %v1024_v40 = vld [vmem:[#allocation4 + $0xc0] sm:$0xff]  ;;  %v1914_v45 = vcombine.low %v1016_v32, %v1020_v33 }
  0x87   :  { %1469 = vmatprep.subr.bf16.mxu1 %v1901_v48  ;;  %v1923_v48 = vcombine.high %v1024_v40, %v1028_v41  ;;  %v1880_v32 = vld [vmem:[%s2599_s3 + $0x1] ss:$0 sm:$0xff]  ;;  %v1889_v33 = vld [vmem:[%s2599_s3 + $0x2] ss:$0 sm:$0xff] }
 0x11b   :  { %v1987_v49 = vpop.f32.mrb[0].mxu0 }
 0x11c   :  { %v2009_v50 = vpop.f32.mrb[0].mxu1  ;;  %v1988_v52 = vpop.f32.mrb[1].mxu0 }
 0x11d   :  { %v1989_v53 = vadd.f32 %v1988_v52, %v1987_v49  ;;  %v2010_v54 = vpop.f32.mrb[1].mxu1  ;;  %v1990_v55 = vpop.f32.mrb[2].mxu0  ;;  %v1925_v49 = vcombine.high %v1025_v42, %v1029_v43  ;;  %v1922_v52 = vcombine.low %v1024_v40, %v1028_v41 }
 0x11e   :  { %v2011_v56 = vadd.f32 %v2010_v54, %v2009_v50  ;;  %v2012_v57 = vpop.f32.mrb[2].mxu1  ;;  %v1991_v58 = vpop.f32.mrb[3].mxu0  ;;  %v1033_v50 = vld [vmem:[#allocation4 + $0x108] sm:$0xff] }
 0x11f   :  { %v679_v59 = vadd.f32 %v1989_v53, %v1815_v51  ;;  %v1992_v60 = vadd.f32 %v1991_v58, %v1990_v55  ;;  %v2013_v61 = vpop.f32.mrb[3].mxu1  ;;  %v1924_v53 = vcombine.low %v1025_v42, %v1029_v43  ;;  %v1041_v58 = vld [vmem:[#allocation4 + $0x148] sm:$0xff] }
 0x120   :  { %v2014_v62 = vadd.f32 %v2013_v61, %v2012_v57  ;;  %v1044_v57 = vld [vmem:[#allocation4 + $0x160] sm:$0xff] }
 0x121   :  { %v720_v63 = vadd.f32 %v2011_v56, %v679_v59  ;;  %v682_v0 = vadd.f32 %v1992_v60, %v1815_v51  ;;  %v1037_v51 = vld [vmem:[#allocation4 + $0x128] sm:$0xff]  ;;  %v1040_v56 = vld [vmem:[#allocation4 + $0x140] sm:$0xff] }
 0x122   :  { %v1933_v55 = vcombine.high %v1033_v50, %v1037_v51  ;;  %v1045_v59 = vld [vmem:[#allocation4 + $0x168] sm:$0xff]  ;;  %v1932_v61 = vcombine.low %v1033_v50, %v1037_v51 }
 0x123   :  { %v723_v1 = vadd.f32 %v2014_v62, %v682_v0  ;;  %v1939_v62 = vcombine.high %v1040_v56, %v1044_v57  ;;  %v1938_v0 = vcombine.low %v1040_v56, %v1044_v57  ;;  %v1018_v56 = vld [vmem:[#allocation4 + $0x90] sm:$0xff] }
 0x13b   :  { %v2031_v2 = vpop.f32.mrb[4].mxu0 }
 0x13c   :  { %v2053_v3 = vpop.f32.mrb[4].mxu1  ;;  %v2032_v4 = vpop.f32.mrb[5].mxu0 }
 0x13d   :  { %v2033_v5 = vadd.f32 %v2032_v4, %v2031_v2  ;;  %v2054_v6 = vpop.f32.mrb[5].mxu1  ;;  %v2034_v7 = vpop.f32.mrb[6].mxu0  ;;  %v1048_v2 = vld [vmem:[#allocation4 + $0x180] sm:$0xff]  ;;  %v1049_v4 = vld [vmem:[#allocation4 + $0x188] sm:$0xff] }
 0x13e   :  { %v2055_v8 = vadd.f32 %v2054_v6, %v2053_v3  ;;  %v2056_v9 = vpop.f32.mrb[6].mxu1  ;;  %v2035_v10 = vpop.f32.mrb[7].mxu0  ;;  %v1052_v3 = vld [vmem:[#allocation4 + $0x1a0] sm:$0xff]  ;;  %v1053_v6 = vld [vmem:[#allocation4 + $0x1a8] sm:$0xff] }
 0x13f   :  { %v761_v11 = vadd.f32 %v2033_v5, %v720_v63  ;;  %v2036_v13 = vadd.f32 %v2035_v10, %v2034_v7  ;;  %v2057_v15 = vpop.f32.mrb[7].mxu1  ;;  %v1941_v63 = vcombine.high %v1041_v58, %v1045_v59  ;;  %v1947_v5 = vcombine.high %v1048_v2, %v1052_v3  ;;  %v1056_v10 = vld [vmem:[#allocation4 + $0x1c0] sm:$0xff] }
 0x140   :  { %v2058_v16 = vadd.f32 %v2057_v15, %v2056_v9  ;;  %v1946_v7 = vcombine.low %v1048_v2, %v1052_v3  ;;  %v1949_v9 = vcombine.high %v1049_v4, %v1053_v6  ;;  %v1026_v2 = vld [vmem:[#allocation4 + $0xd0] sm:$0xff] }
 0x141   :  { %v802_v17 = vadd.f32 %v2055_v8, %v761_v11  ;;  %v764_v19 = vadd.f32 %v2036_v13, %v723_v1  ;;  %v1940_v1 = vcombine.low %v1041_v58, %v1045_v59  ;;  %v1948_v8 = vcombine.low %v1049_v4, %v1053_v6  ;;  %v1060_v11 = vld [vmem:[#allocation4 + $0x1e0] sm:$0xff]  ;;  %v1057_v13 = vld [vmem:[#allocation4 + $0x1c8] sm:$0xff]  ;;  %v1022_v58 = vld [vmem:[#allocation4 + $0xb0] sm:$0xff] }
 0x142   :  { %v1955_v15 = vcombine.high %v1056_v10, %v1060_v11  ;;  %v1019_v59 = vld [vmem:[#allocation4 + $0x98] sm:$0xff]  ;;  %v1030_v3 = vld [vmem:[#allocation4 + $0xf0] sm:$0xff]  ;;  %v1918_v6 = vcombine.low %v1018_v56, %v1022_v58 }
 0x143   :  { %v805_v21 = vadd.f32 %v2058_v16, %v764_v19  ;;  %v808_v27 = vmax.f32 %v802_v17, 0.0  ;;  %v1061_v16 = vld [vmem:[#allocation4 + $0x1e8] sm:$0xff]  ;;  %v1954_v17 = vcombine.low %v1056_v10, %v1060_v11  ;;  %v1027_v4 = vld [vmem:[#allocation4 + $0xd8] sm:$0xff]  ;;  %v1034_v10 = vld [vmem:[#allocation4 + $0x110] sm:$0xff] }
 0x144   :  { %v1956_v19 = vcombine.low %v1057_v13, %v1061_v16  ;;  %v1038_v11 = vld [vmem:[#allocation4 + $0x130] sm:$0xff] }
 0x145   :  { %v809_v28 = vmax.f32 %v805_v21, 0.0  ;;  %v1957_v21 = vcombine.high %v1057_v13, %v1061_v16  ;;  %v1035_v13 = vld [vmem:[#allocation4 + $0x118] sm:$0xff]  ;;  %v1926_v16 = vcombine.low %v1026_v2, %v1030_v3 }
 0x147   :  { %v810_v29 = vpack.c.bf16 %v809_v28, %v808_v27  ;;  %v1903_v27 = vcombine.high %v1002_v22, %v1006_v23  ;;  %v1007_v28 = vld [vmem:[#allocation4 + $0x38] sm:$0xff]  ;;  %v1042_v22 = vld [vmem:[#allocation4 + $0x150] sm:$0xff] }
 0x148   :  { %v1046_v23 = vld [vmem:[#allocation4 + $0x170] sm:$0xff] }
 0x149   :  { %2103 = vmatmul.mubr.bf16.vlgmr.msra.gmra.mrb[8].mxu0 %v810_v29  ;;  %2123 = vmatmul.mubr.bf16.vlgmr.msra.gmra.mrb[8].mxu1 %v810_v29  ;;  %v2311_v29 = vmov 0  }
 0x14a   :  { %1427 = vmatpush1.bf16.msra.mxu0 %v1898_v44  ;;  %1470 = vmatpush1.bf16.msra.mxu1 %v1900_v47  ;;  %v1032_v44 = vld [vmem:[#allocation4 + $0x100] sm:$0xff] }
 0x14b   :  { %1428 = vmatprep.subr.bf16.mxu0 %v1907_v30  ;;  %1471 = vmatprep.subr.bf16.mxu1 %v1909_v31  ;;  %v1036_v47 = vld [vmem:[#allocation4 + $0x120] sm:$0xff]  ;;  %v1904_v30 = vcombine.low %v1003_v24, %v1007_v28  ;;  %v1905_v31 = vcombine.high %v1003_v24, %v1007_v28  ;;  %v1043_v24 = vld [vmem:[#allocation4 + $0x158] sm:$0xff] }
 0x14c   :  { %v1931_v54 = vcombine.high %v1032_v44, %v1036_v47  ;;  %v1930_v60 = vcombine.low %v1032_v44, %v1036_v47  ;;  %1458 = vmatprep.mubr.bf16.mxu0 %v2311_v29  ;;  %1501 = vmatprep.mubr.bf16.mxu1 %v2311_v29  ;;  %v1014_v44 = vld [vmem:[#allocation4 + $0x70] sm:$0xff] }
 0x14e   :  { %1429 = vmatpush1.bf16.msra.mxu0 %v1906_v36  ;;  %1472 = vmatpush1.bf16.msra.mxu1 %v1908_v37 }
 0x14f   :  { %1430 = vmatprep.subr.bf16.mxu0 %v1915_v38  ;;  %1473 = vmatprep.subr.bf16.mxu1 %v1917_v39 }
 0x152   :  { %1431 = vmatpush1.bf16.msra.mxu0 %v1914_v45  ;;  %1474 = vmatpush1.bf16.msra.mxu1 %v1916_v46 }
 0x153   :  { %1432 = vmatprep.subr.bf16.mxu0 %v1923_v48  ;;  %1475 = vmatprep.subr.bf16.mxu1 %v1925_v49  ;;  %v1010_v49 = vld [vmem:[#allocation4 + $0x50] sm:$0xff] }
 0x156   :  { %1433 = vmatpush1.bf16.msra.mxu0 %v1922_v52  ;;  %1476 = vmatpush1.bf16.msra.mxu1 %v1924_v53  ;;  %v1011_v52 = vld [vmem:[#allocation4 + $0x58] sm:$0xff] }
 0x157   :  { %1434 = vmatprep.subr.bf16.mxu0 %v1931_v54  ;;  %1477 = vmatprep.subr.bf16.mxu1 %v1933_v55  ;;  %v1015_v53 = vld [vmem:[#allocation4 + $0x78] sm:$0xff]  ;;  %v1911_v55 = vcombine.high %v1010_v49, %v1014_v44 }
 0x158   :  { %v1913_v57 = vcombine.high %v1011_v52, %v1015_v53 }
 0x15a   :  { %1435 = vmatpush1.bf16.msra.mxu0 %v1930_v60  ;;  %1478 = vmatpush1.bf16.msra.mxu1 %v1932_v61  ;;  %v1023_v60 = vld [vmem:[#allocation4 + $0xb8] sm:$0xff] }
 0x15b   :  { %1436 = vmatprep.subr.bf16.mxu0 %v1939_v62  ;;  %1479 = vmatprep.subr.bf16.mxu1 %v1941_v63  ;;  %v1910_v62 = vcombine.low %v1010_v49, %v1014_v44  ;;  %v1912_v63 = vcombine.low %v1011_v52, %v1015_v53  ;;  %v2235_v52 = vld [vmem:[#allocation2 + $0x280] sm:$0xff]   ;;  %v2236_v53 = vld [vmem:[#allocation2 + $0x288] sm:$0xff]  }
 0x15e   :  { %1437 = vmatpush1.bf16.msra.mxu0 %v1938_v0  ;;  %1480 = vmatpush1.bf16.msra.mxu1 %v1940_v1  ;;  %v1919_v0 = vcombine.high %v1018_v56, %v1022_v58  ;;  %v1921_v1 = vcombine.high %v1019_v59, %v1023_v60  ;;  %v2238_v56 = vld [vmem:[#allocation2 + $0x298] sm:$0xff]   ;;  %v2241_v58 = vld [vmem:[#allocation2 + $0x2b0] sm:$0xff]  }
 0x15f   :  { %1438 = vmatprep.subr.bf16.mxu0 %v1947_v5  ;;  %1481 = vmatprep.subr.bf16.mxu1 %v1949_v9  ;;  %v1031_v5 = vld [vmem:[#allocation4 + $0xf8] sm:$0xff] }
 0x160   :  { %v1929_v9 = vcombine.high %v1027_v4, %v1031_v5 }
 0x162   :  { %1439 = vmatpush1.bf16.msra.mxu0 %v1946_v7  ;;  %1482 = vmatpush1.bf16.msra.mxu1 %v1948_v8  ;;  %v1920_v7 = vcombine.low %v1019_v59, %v1023_v60  ;;  %v1927_v8 = vcombine.high %v1026_v2, %v1030_v3  ;;  %v2242_v59 = vld [vmem:[#allocation2 + $0x2b8] sm:$0xff]   ;;  %v1066_v60 = vlaneseq }
 0x163   :  { %1440 = vmatprep.subr.bf16.mxu0 %v1955_v15  ;;  %1483 = vmatprep.subr.bf16.mxu1 %v1957_v21  ;;  %v1039_v15 = vld [vmem:[#allocation4 + $0x138] sm:$0xff] }
 0x164   :  { %v1937_v21 = vcombine.high %v1035_v13, %v1039_v15  ;;  %v1936_v28 = vcombine.low %v1035_v13, %v1039_v15  ;;  %v2251_v15 = vld [vmem:[%s2596_s0] sm:$0xff] }
 0x166   :  { %1441 = vmatpush1.bf16.msra.mxu0 %v1954_v17  ;;  %1484 = vmatpush1.bf16.msra.mxu1 %v1956_v19  ;;  %v1928_v17 = vcombine.low %v1027_v4, %v1031_v5  ;;  %v1935_v19 = vcombine.high %v1034_v10, %v1038_v11 }
 0x167   :  { %1512 = vmatprep.subr.bf16.mxu0 %v1903_v27  ;;  %1555 = vmatprep.subr.bf16.mxu1 %v1905_v31  ;;  %v1934_v27 = vcombine.low %v1034_v10, %v1038_v11  ;;  %v1050_v31 = vld [vmem:[#allocation4 + $0x190] sm:$0xff] }
 0x21c   :  { %v897_v34 = vpop.f32.mrb[8].mxu0  ;;  %v990_v35 = vpop.f32.mrb[8].mxu1 }
 0x21d   :  { %v2469_v36 = vadd.f32 %v1880_v32, %v897_v34  ;;  %v991_v37 = vadd.f32 %v1889_v33, %v990_v35  ;;  %v2104_v38 = vpop.f32.mrb[9].mxu0  ;;  %v2124_v39 = vpop.f32.mrb[9].mxu1  ;;  %v1055_v34 = vld [vmem:[#allocation4 + $0x1b8] sm:$0xff]  ;;  %v1942_v35 = vcombine.low %v1042_v22, %v1046_v23 }
 0x21e   :  { %v900_v40 = vpop.f32.mrb[10].mxu0  ;;  %v993_v41 = vpop.f32.mrb[10].mxu1 }
 0x21f   :  { %1734 = vst [vmem:[%s2601_s5] sm:$0xff] %v2469_v36  ;;  %v2475_v42 = vadd.f32 %v1880_v32, %v900_v40  ;;  %v994_v43 = vadd.f32 %v1889_v33, %v993_v41  ;;  %v2105_v45 = vpop.f32.mrb[11].mxu0  ;;  %v2125_v46 = vpop.f32.mrb[11].mxu1  ;;  %v1704_v48 = vmul.f32 %v2469_v36, %v2469_v36  ;;  %v997_v47 = vmax.f32 %v991_v37, 0.0  ;;  %v1054_v32 = vld [vmem:[#allocation4 + $0x1b0] sm:$0xff]  ;;  %v1051_v33 = vld [vmem:[#allocation4 + $0x198] sm:$0xff] }
 0x220   :  { %v1951_v38 = vcombine.high %v1050_v31, %v1054_v32  ;;  %v1953_v39 = vcombine.high %v1051_v33, %v1055_v34  ;;  %v1058_v40 = vld [vmem:[#allocation4 + $0x1d0] sm:$0xff]  ;;  %v1063_v45 = vld [vmem:[#allocation4 + $0x1f8] sm:$0xff]  ;;  %v1950_v46 = vcombine.low %v1050_v31, %v1054_v32 }
 0x221   :  { %v1614_v50 = vpack.c.bf16 %v2475_v42, %v2469_v36  ;;  %1736 = vst [vmem:[%s2601_s5 + $0x10] sm:$0xff] %v2475_v42  ;;  %v998_v51 = vmax.f32 %v994_v43, 0.0  ;;  %1706 = vadd.xlane.f32.xlu0 %v1704_v48  ;;  %v1705_v61 = vmul.f32 %v2475_v42, %v2475_v42  ;;  %v1062_v41 = vld [vmem:[#allocation4 + $0x1f0] sm:$0xff]  ;;  %v1059_v43 = vld [vmem:[#allocation4 + $0x1d8] sm:$0xff]  ;;  %v1952_v48 = vcombine.low %v1051_v33, %v1055_v34 }
 0x222   :  { %v1959_v49 = vcombine.high %v1058_v40, %v1062_v41  ;;  %v1961_v44 = vcombine.high %v1059_v43, %v1063_v45  ;;  %v2254_v32 = vld [vmem:[%s2596_s0 + $0x18] sm:$0xff] }
 0x223   :  { %v2485_v54 = vpack.c.bf16 %v998_v51, %v997_v47  ;;  %v1958_v47 = vcombine.low %v1058_v40, %v1062_v41  ;;  %v1960_v51 = vcombine.low %v1059_v43, %v1063_v45 }
 0x225   :  { %1459 = vmatmul.mubr.bf16.vlgmr.msra.gmra.mrb[12].mxu0 %v2485_v54  ;;  %1502 = vmatmul.mubr.bf16.vlgmr.msra.gmra.mrb[12].mxu1 %v2485_v54 }
 0x226   :  { %1513 = vmatpush1.bf16.msra.mxu0 %v1902_v25  ;;  %1556 = vmatpush1.bf16.msra.mxu1 %v1904_v30  ;;  %v1047_v25 = vld [vmem:[#allocation4 + $0x178] sm:$0xff] }
 0x227   :  { %1708 = vadd.xlane.f32.xlu0 %v1705_v61  ;;  %1514 = vmatprep.subr.bf16.mxu0 %v1911_v55  ;;  %v1945_v30 = vcombine.high %v1043_v24, %v1047_v25  ;;  %v1944_v37 = vcombine.low %v1043_v24, %v1047_v25  ;;  %v2237_v55 = vld [vmem:[#allocation2 + $0x290] sm:$0xff]   ;;  %v2506_v61 = vshrl.u32 %v1066_v60, 7  ;;  %v2253_v25 = vld [vmem:[%s2596_s0 + $0x8] sm:$0xff] }
 0x228   :  { %1557 = vmatprep.subr.bf16.mxu1 %v1913_v57  ;;  %1544 = vmatprep.mubr.bf16.mxu0 %v2311_v29  ;;  %v2239_v57 = vld [vmem:[#allocation2 + $0x2a0] sm:$0xff]  }
 0x229   :  { %1587 = vmatprep.mubr.bf16.mxu1 %v2311_v29  ;;  %v1943_v29 = vcombine.high %v1042_v22, %v1046_v23  ;;  %v2252_v23 = vld [vmem:[%s2596_s0 + $0x10] sm:$0xff]  ;;  %v1084_v40 = vsub.s32 4, %v2506_v61  ;;  %v1092_v41 = vsub.s32 6, %v2506_v61  ;;  %v1088_v43 = vsub.s32 5, %v2506_v61 }
 0x22a   :  { %1515 = vmatpush1.bf16.msra.mxu0 %v1910_v62  ;;  %1558 = vmatpush1.bf16.msra.mxu1 %v1912_v63  ;;  %v1068_v62 = vsub.s32 0, %v2506_v61  ;;  %v1076_v63 = vsub.s32 2, %v2506_v61  ;;  %v1096_v45 = vsub.s32 7, %v2506_v61  ;;  %vm1795_vm1 = vcmp.lt.s32.totalorder %v2506_v61, 2 }
 0x22b   :  { %1516 = vmatprep.subr.bf16.mxu0 %v1919_v0  ;;  %1559 = vmatprep.subr.bf16.mxu1 %v1921_v1  ;;  %v1064_v0 = vld [vmem:[%s2600_s4] sm:$0xff]  ;;  %v1072_v1 = vsub.s32 1, %v2506_v61 }
 0x22c   :  { %v1069_v2 = vrot.slane %v1064_v0, %v1068_v62  ;;  %v1077_v3 = vrot.slane %v1064_v0, %v1076_v63 }
 0x22d   :  { %v1073_v4 = vrot.slane %v1064_v0, %v1072_v1 }
 0x22e   :  { %1517 = vmatpush1.bf16.msra.mxu0 %v1918_v6  ;;  %1560 = vmatpush1.bf16.msra.mxu1 %v1920_v7 }
 0x22f   :  { %1518 = vmatprep.subr.bf16.mxu0 %v1927_v8  ;;  %1561 = vmatprep.subr.bf16.mxu1 %v1929_v9 }
 0x232   :  { %1519 = vmatpush1.bf16.msra.mxu0 %v1926_v16  ;;  %1562 = vmatpush1.bf16.msra.mxu1 %v1928_v17 }
 0x233   :  { %1520 = vmatprep.subr.bf16.mxu0 %v1935_v19  ;;  %1563 = vmatprep.subr.bf16.mxu1 %v1937_v21 }
 0x236   :  { %1521 = vmatpush1.bf16.msra.mxu0 %v1934_v27  ;;  %1564 = vmatpush1.bf16.msra.mxu1 %v1936_v28 }
 0x237   :  { %1522 = vmatprep.subr.bf16.mxu0 %v1943_v29  ;;  %1565 = vmatprep.subr.bf16.mxu1 %v1945_v30 }
 0x23a   :  { %1523 = vmatpush1.bf16.msra.mxu0 %v1942_v35  ;;  %1566 = vmatpush1.bf16.msra.mxu1 %v1944_v37 }
 0x23b   :  { %1524 = vmatprep.subr.bf16.mxu0 %v1951_v38  ;;  %1567 = vmatprep.subr.bf16.mxu1 %v1953_v39 }
 0x23e   :  { %1525 = vmatpush1.bf16.msra.mxu0 %v1950_v46  ;;  %1568 = vmatpush1.bf16.msra.mxu1 %v1952_v48  ;;  %v1085_v46 = vrot.slane %v1064_v0, %v1084_v40  ;;  %v1093_v48 = vrot.slane %v1064_v0, %v1092_v41 }
 0x23f   :  { %1526 = vmatprep.subr.bf16.mxu0 %v1959_v49  ;;  %1569 = vmatprep.subr.bf16.mxu1 %v1961_v44  ;;  %v1089_v49 = vrot.slane %v1064_v0, %v1088_v43  ;;  %v1097_v44 = vrot.slane %v1064_v0, %v1096_v45 }
 0x242   :  { %1527 = vmatpush1.bf16.msra.mxu0 %v1958_v47  ;;  %1570 = vmatpush1.bf16.msra.mxu1 %v1960_v51 }
 0x243   :  { %2126 = vmatprep.subr.bf16.mxu0 %v2309_v26 }
 0x245   :  { %1545 = vmatmul.mubr.bf16.vlgmr.msra.gmra.mrb[16].mxu0 %v2485_v54  ;;  %1588 = vmatmul.mubr.bf16.vlgmr.msra.gmra.mrb[16].mxu1 %v2485_v54  ;;  %v2240_v54 = vld [vmem:[#allocation2 + $0x2a8] sm:$0xff]  }
 0x246   :  { %2127 = vmatpush3.bf16.msra.mxu0 %v2235_v52  ;;  %2142 = vmatprep.mubr.msk.bf16.mxu0 %vm2310_vm0, %v2309_v26 }
 0x247   :  { %2128 = vmatprep.subr.bf16.mxu0 %v2309_v26 }
 0x24a   :  { %2129 = vmatpush3.bf16.msra.mxu0 %v2236_v53 }
 0x24b   :  { %2130 = vmatprep.subr.bf16.mxu0 %v2309_v26 }
 0x24e   :  { %2131 = vmatpush3.bf16.msra.mxu0 %v2237_v55 }
 0x24f   :  { %2132 = vmatprep.subr.bf16.mxu0 %v2309_v26 }
 0x252   :  { %2133 = vmatpush3.bf16.msra.mxu0 %v2238_v56 }
 0x253   :  { %2134 = vmatprep.subr.bf16.mxu0 %v2309_v26 }
 0x256   :  { %2135 = vmatpush3.bf16.msra.mxu0 %v2239_v57 }
 0x257   :  { %2136 = vmatprep.subr.bf16.mxu0 %v2309_v26 }
 0x25a   :  { %2137 = vmatpush3.bf16.msra.mxu0 %v2240_v54 }
 0x25b   :  { %2138 = vmatprep.subr.bf16.mxu0 %v2309_v26 }
 0x25e   :  { %2139 = vmatpush3.bf16.msra.mxu0 %v2241_v58 }
 0x25f   :  { %2140 = vmatprep.subr.bf16.mxu0 %v2309_v26  ;;  %v1080_v26 = vsub.s32 3, %v2506_v61 }
 0x261   :  { %v1081_v36 = vrot.slane %v1064_v0, %v1080_v26 }
 0x262   :  { %2141 = vmatpush3.bf16.msra.mxu0 %v2242_v59 }
 0x265   :  { %2143 = vmatmul.mubr.bf16.vlgmr.msra.gmra.mrb[20].mxu0 %v1614_v50 }
 0x2f8   :  { %v1460_v42 = vpop.f32.mrb[12].mxu0  ;;  %v1503_v50 = vpop.f32.mrb[12].mxu1 }
 0x2f9   :  { %v1461_v5 = vadd.f32 %v1460_v42, %v1069_v2  ;;  %v1504_v6 = vadd.f32 %v1503_v50, %v1077_v3  ;;  %v1462_v7 = vpop.f32.mrb[13].mxu0  ;;  %v1505_v8 = vpop.f32.mrb[13].mxu1 }
 0x2fa   :  { %v1463_v9 = vadd.f32 %v1462_v7, %v1073_v4  ;;  %v1506_v10 = vadd.f32 %v1505_v8, %v1081_v36  ;;  %v1464_v11 = vpop.f32.mrb[14].mxu0  ;;  %v1507_v13 = vpop.f32.mrb[14].mxu1 }
 0x2fb   :  { %1598 = vst [vmem:[%s2602_s6] sm:$0xff] %v1461_v5  ;;  %v1738_v16 = vsub.f32 %v1461_v5, %v2251_v15  ;;  %1600 = vst [vmem:[%s2602_s6 + $0x10] sm:$0xff] %v1504_v6  ;;  %v1465_v17 = vadd.f32 %v1464_v11, %v1069_v2  ;;  %v1508_v19 = vadd.f32 %v1507_v13, %v1077_v3  ;;  %v1466_v21 = vpop.f32.mrb[15].mxu0  ;;  %v1509_v22 = vpop.f32.mrb[15].mxu1 }
 0x2fc   :  { %v1740_v24 = vsub.f32 %v1504_v6, %v2252_v23  ;;  %1599 = vst [vmem:[%s2602_s6 + $0x8] sm:$0xff] %v1463_v9  ;;  %v1739_v27 = vsub.f32 %v1463_v9, %v2253_v25  ;;  %1601 = vst [vmem:[%s2602_s6 + $0x18] sm:$0xff] %v1506_v10  ;;  %v1467_v28 = vadd.f32 %v1466_v21, %v1073_v4  ;;  %v1707_v8 = vpop.xlane.xlu0 %1706  ;;  %v1970_v9 = vld [vmem:[%s2599_s3 + $0x3] ss:$0 sm:$0xff] }
 0x2fd   :  { %v1510_v29 = vadd.f32 %v1509_v22, %v1081_v36  ;;  %v1754_v30 = vmul.f32 %v1738_v16, %v1738_v16  ;;  %1606 = vst [vmem:[%s2602_s6 + $0x40] sm:$0xff] %v1465_v17  ;;  %1608 = vst [vmem:[%s2602_s6 + $0x50] sm:$0xff] %v1508_v19  ;;  %v1741_v33 = vsub.f32 %v1506_v10, %v2254_v32 }
 0x2fe   :  { %v1755_v31 = vmul.f32 %v1739_v27, %v1739_v27  ;;  %1607 = vst [vmem:[%s2602_s6 + $0x48] sm:$0xff] %v1467_v28  ;;  %v1756_v34 = vmul.f32 %v1740_v24, %v1740_v24  ;;  %v1714_v13 = vadd.f32 %v1970_v9, %v1707_v8 }
 0x2ff   :  { %1609 = vst [vmem:[%s2602_s6 + $0x58] sm:$0xff] %v1510_v29  ;;  %v1757_v37 = vmul.f32 %v1741_v33, %v1741_v33 }
 0x300   :  { %v1770_v35 = vadd.f32 %v1755_v31, %v1754_v30  ;;  %v1709_v10 = vpop.xlane.xlu0 %1708 }
 0x301   :  { %v1715_v19 = vadd.f32 %v1970_v9, %v1709_v10 }
 0x302   :  { %v1771_v38 = vadd.f32 %v1770_v35, %v1756_v34 }
 0x304   :  { %v1772_v39 = vadd.f32 %v1771_v38, %v1757_v37 }
 0x318   :  { %v1546_v47 = vpop.f32.mrb[16].mxu0  ;;  %v1589_v51 = vpop.f32.mrb[16].mxu1 }
 0x319   :  { %v1547_v52 = vadd.f32 %v1546_v47, %v1085_v46  ;;  %v1590_v53 = vadd.f32 %v1589_v51, %v1093_v48  ;;  %v1548_v55 = vpop.f32.mrb[17].mxu0  ;;  %v1591_v56 = vpop.f32.mrb[17].mxu1 }
 0x31a   :  { %v1549_v57 = vadd.f32 %v1548_v55, %v1089_v49  ;;  %v1592_v54 = vadd.f32 %v1591_v56, %v1097_v44  ;;  %v1550_v58 = vpop.f32.mrb[18].mxu0  ;;  %v1593_v59 = vpop.f32.mrb[18].mxu1 }
 0x31b   :  { %1602 = vst [vmem:[%s2602_s6 + $0x20] sm:$0xff] %v1547_v52  ;;  %v1742_v60 = vsub.f32 %v1547_v52, %v2421_v18  ;;  %1604 = vst [vmem:[%s2602_s6 + $0x30] sm:$0xff] %v1590_v53  ;;  %v1551_v62 = vadd.f32 %v1550_v58, %v1085_v46  ;;  %v1594_v63 = vadd.f32 %v1593_v59, %v1093_v48  ;;  %v1552_v0 = vpop.f32.mrb[19].mxu0  ;;  %v1595_v1 = vpop.f32.mrb[19].mxu1 }
 0x31c   :  { %1603 = vst [vmem:[%s2602_s6 + $0x28] sm:$0xff] %v1549_v57  ;;  %v1743_v26 = vsub.f32 %v1549_v57, %v2403_v12  ;;  %1605 = vst [vmem:[%s2602_s6 + $0x38] sm:$0xff] %v1592_v54  ;;  %v1553_v2 = vadd.f32 %v1552_v0, %v1089_v49  ;;  %v1596_v18 = vadd.f32 %v1595_v1, %v1097_v44 }
 0x31d   :  { %v1758_v3 = vmul.f32 %v1742_v60, %v1742_v60  ;;  %v1744_v4 = vsub.f32 %v1590_v53, %v2429_v20  ;;  %1610 = vst [vmem:[%s2602_s6 + $0x60] sm:$0xff] %v1551_v62  ;;  %1612 = vst [vmem:[%s2602_s6 + $0x70] sm:$0xff] %v1594_v63  ;;  %v1745_v20 = vsub.f32 %v1592_v54, %v2411_v14 }
 0x31e   :  { %v1759_v36 = vmul.f32 %v1743_v26, %v1743_v26  ;;  %1611 = vst [vmem:[%s2602_s6 + $0x68] sm:$0xff] %v1553_v2  ;;  %1613 = vst [vmem:[%s2602_s6 + $0x78] sm:$0xff] %v1596_v18 }
 0x31f   :  { %v1773_v12 = vadd.f32 %v1772_v39, %v1758_v3  ;;  %v1760_v42 = vmul.f32 %v1744_v4, %v1744_v4  ;;  %v1761_v5 = vmul.f32 %v1745_v20, %v1745_v20 }
 0x321   :  { %v1774_v50 = vadd.f32 %v1773_v12, %v1759_v36 }
 0x323   :  { %v1775_v6 = vadd.f32 %v1774_v50, %v1760_v42 }
 0x325   :  { %v1776_v7 = vadd.f32 %v1775_v6, %v1761_v5 }
 0x327   :  { %1777 = vadd.xlane.f32.xlu0 %v1776_v7 }
 0x338   :  { %v1697_v11 = vpop.f32.mrb[20].mxu0 }
 0x339   :  { %v1716_v15 = vmul.f32 2.0, %v1697_v11  ;;  %v2144_v16 = vpop.f32.mrb[21].mxu0 }
 0x33a   :  { %v1700_v17 = vpop.f32.mrb[22].mxu0 }
 0x33b   :  { %v1718_v21 = vsub.f32 %v1714_v13, %v1716_v15  ;;  %v1717_v14 = vmul.f32 2.0, %v1700_v17  ;;  %v2145_v22 = vpop.f32.mrb[23].mxu0 }
 0x33d   :  { %v1720_v23 = vmax.f32 %v1718_v21, 0.0  ;;  %v1719_v24 = vsub.f32 %v1715_v19, %v1717_v14 }
 0x33f   :  { %v1722_v25 = vadd.f32 1.0, %v1720_v23  ;;  %v1721_v27 = vmax.f32 %v1719_v24, 0.0 }
 0x341   :  { %2243 = vrcp.f32 %v1722_v25  ;;  %v1723_v28 = vadd.f32 1.0, %v1721_v27 }
 0x343   :  { %2245 = vrcp.f32 %v1723_v28 }
 0x34b   :  { %v2244_v29 = vpop.eup %2243 }
 0x34c   :  { %1726 = vadd.xlane.f32.xlu1 %v2244_v29 }
 0x34d   :  { %v2246_v30 = vpop.eup %2245 }
 0x350   :  { %1728 = vadd.xlane.f32.xlu1 %v2246_v30 }
 0x3b4   :  { %v1778_v31 = vpop.xlane.xlu0 %1777 }
 0x3b5   :  { %v1797_v32 = vsel %vm1795_vm1, %v1778_v31, 0.0 }
 0x3b6   :  { %1799 = vst [vmem:[%s2603_s7] sm:$0xff] %v1797_v32 }
 0x3d9   :  { %v1727_v33 = vpop.xlane.xlu1 %1726 }
 0x3da   :  { %2247 = vrcp.f32 %v1727_v33 }
 0x3dd   :  { %v1729_v34 = vpop.xlane.xlu1 %1728 }
 0x3de   :  { %2249 = vrcp.f32 %v1729_v34 }
 0x3e4   :  { %v2248_v35 = vpop.eup %2247 }
 0x3e5   :  { %v1732_v37 = vmul.f32 %v2248_v35, %v2244_v29 }
 0x3e7   :  { %1735 = vst [vmem:[%s2601_s5 + $0x8] sm:$0xff] %v1732_v37 }
 0x3e8   :  { %v2250_v38 = vpop.eup %2249 }
 0x3e9   :  { %v1733_v39 = vmul.f32 %v2250_v38, %v2246_v30 }
 0x3eb   :  { %1737 = vst [vmem:[%s2601_s5 + $0x18] sm:$0xff] %v1733_v39 }
 0x3ec   :  { %1813 = vsyncpa [#allocation3], 1 }
 0x3ed   :  { %1814 = vsyncpa [#allocation5], 1 }

</bundles_post_ra>
